<compile_context>
chip_gen: v5e
topology: v5e:2x2
jax: 0.10.0
libtpu: 0.0.40
codegen_flags: <defaults>
</compile_context>

<pallas_src>
import functools

import jax
import jax.numpy as jnp
from jax.experimental import pallas as pl
from jax.experimental.pallas import tpu as pltpu

LANES = 128


# ----------------------------------------------------------------------------
# Fused kernel: per row-tile of the lane-dense layout
#   - scatter per-element compression radii (clamp already folded in)
#   - per-tile, per-lane partial sum of squared pred/ref differences
# ----------------------------------------------------------------------------
def _optvcr_fused_kernel(vals_ref, uan_ref, an_ref, pred_ref, ref_ref,
                         compr_ref, partial_ref, *, n_unique):
    # ---- compr build ("for ii, iu in enumerate(uan): compr[an == iu] = v[ii]")
    an = an_ref[...]                                        # int32 [TR, 128]
    # vals_ref[n_unique] is the value padding atoms (an == 0) take after the
    # global clamp (0.0 when no clamp triggers, matching torch clamp_ exactly).
    compr = jnp.broadcast_to(vals_ref[n_unique], an.shape)
    for i in range(n_unique):          # static unroll; U is small (<~10)
        compr = jnp.where(an == uan_ref[i], vals_ref[i], compr)
    compr_ref[...] = compr

    # ---- weighted MSE partial: f32 accumulation, lane-dense (128-wide) store
    d = pred_ref[...].astype(jnp.float32) - ref_ref[...].astype(jnp.float32)
    psum = jnp.sum(d * d, axis=0, keepdims=True)            # [1, 128] (XLU)
    partial_ref[...] = psum.reshape(1, 1, partial_ref.shape[-1])


# ----------------------------------------------------------------------------
# One "forward training step" of OptVcr._update_train / Model.__loss__ /
# Model._check('OptVcr') (the parts expressible without the SKF feeds and the
# eigensolver).
# ----------------------------------------------------------------------------
def optvcr_step(atomic_numbers, uan, compr0, pred, ref, *,
                comp_r_min, comp_r_max, target_weight,
                prev_loss, tolerance, tile_rows=None):
    B, N = atomic_numbers.shape
    total = B * N
    U = int(uan.shape[0])

    an32 = atomic_numbers.astype(jnp.int32)
    uan32 = uan.astype(jnp.int32)
    compr0 = compr0.astype(jnp.float32)

    # ---- pass 1 (tiny XLA reduction): whole-tensor clamp flags --------------
    # PyTorch checks `compr[compr != 0]` over the WHOLE tensor before clamping.
    # compr's nonzero entries are exactly the nonzero compr0 values of elements
    # present in atomic_numbers, so the global flags reduce to a presence test.
    # Resolving them here keeps exact torch semantics when the kernel is tiled.
    present = jnp.any(an32.reshape(-1, 1) == uan32.reshape(1, -1), axis=0)
    nz0 = compr0 != 0.0
    any_below = jnp.any(present & nz0 & (compr0 < comp_r_min))
    any_above = jnp.any(present & nz0 & (compr0 > comp_r_max))
    # Fold the conditional clamp into the per-element values; also compute the
    # value padding atoms (compr == 0) take, since torch's clamp_ hits them too.
    compr0_eff = jnp.where(any_below, jnp.maximum(compr0, comp_r_min), compr0)
    compr0_eff = jnp.where(any_above, jnp.minimum(compr0_eff, comp_r_max),
                           compr0_eff)
    pad_val = jnp.zeros((), jnp.float32)
    pad_val = jnp.where(any_below, jnp.maximum(pad_val, comp_r_min), pad_val)
    pad_val = jnp.where(any_above, jnp.minimum(pad_val, comp_r_max), pad_val)
    vals = jnp.concatenate([compr0_eff, pad_val[None]])      # SMEM [U + 1]

    # ---- lane-dense layout: [B, N] -> [rows_pad, 128] -----------------------
    rows = pl.cdiv(total, LANES)
    if tile_rows is None:
        tile_rows = min(512, ((rows + 7) // 8) * 8)
    tile_rows = max(8, (int(tile_rows) // 8) * 8)             # (8, 128) rule
    rows_pad = pl.cdiv(rows, tile_rows) * tile_rows
    n_flat = rows_pad * LANES
    grid = rows_pad // tile_rows

    def lane_dense(x):
        xf = x.reshape(-1)
        xf = jnp.pad(xf, (0, n_flat - total))                 # pad with zeros
        return xf.reshape(rows_pad, LANES)

    an_l = lane_dense(an32)          # padded atoms -> 0 (tbmalt convention)
    pred_l = lane_dense(pred)        # pad pred/ref identically -> diff == 0
    ref_l = lane_dense(ref)

    # ---- cost hint so XLA can overlap this small call with neighbours -------
    isz = lambda a: jnp.dtype(a.dtype).itemsize
    cost = pl.CostEstimate(
        flops=int(n_flat * (2 * U + 3)),
        transcendentals=0,
        bytes_accessed=int(n_flat * (isz(an_l) + isz(pred_l) + isz(ref_l) + 4)
                           + grid * LANES * 4 + (2 * U + 1) * 4))

    kernel = functools.partial(_optvcr_fused_kernel, n_unique=U)
    compr_l, partials = pl.pallas_call(
        kernel,
        out_shape=(
            jax.ShapeDtypeStruct((rows_pad, LANES), jnp.float32),   # compr
            jax.ShapeDtypeStruct((grid, 1, LANES), jnp.float32),    # partials
        ),
        grid=(grid,),
        in_specs=[
            pl.BlockSpec(memory_space=pltpu.SMEM),                  # vals
            pl.BlockSpec(memory_space=pltpu.SMEM),                  # uan
            pl.BlockSpec((tile_rows, LANES), lambda i: (i, 0)),     # an
            pl.BlockSpec((tile_rows, LANES), lambda i: (i, 0)),     # pred
            pl.BlockSpec((tile_rows, LANES), lambda i: (i, 0)),     # ref
        ],
        out_specs=(
            pl.BlockSpec((tile_rows, LANES), lambda i: (i, 0)),     # compr
            pl.BlockSpec((1, 1, LANES), lambda i: (i, 0, 0)),       # partials
        ),
        compiler_params=pltpu.CompilerParams(
            dimension_semantics=("parallel",)),                     # megacore
        cost_estimate=cost,
    )(vals, uan32, an_l, pred_l, ref_l)

    # ---- finalize (tiny) -----------------------------------------------------
    compr = compr_l.reshape(-1)[:total].reshape(B, N)
    # mean over the padded [B, N] tensor (matches torch MSELoss(reduction='mean'))
    loss = jnp.sum(partials) * (float(target_weight) / float(total))
    reach_convergence = jnp.abs(loss - prev_loss) < tolerance       # __loss__
    return compr, loss, reach_convergence


# ----------------------------------------------------------------------------
# Pure-JAX reference with torch semantics (for correctness checking only).
# ----------------------------------------------------------------------------
def _torch_semantics_ref(an, uan, compr0, pred, ref, r_min, r_max, weight):
    compr = jnp.zeros(an.shape, jnp.float32)
    for i in range(int(uan.shape[0])):
        compr = jnp.where(an == uan[i], compr0[i], compr)
    nz = compr != 0.0
    if bool(jnp.any(nz & (compr < r_min))):
        compr = jnp.maximum(compr, r_min)
    if bool(jnp.any(nz & (compr > r_max))):
        compr = jnp.minimum(compr, r_max)
    loss = jnp.mean((pred.astype(jnp.float32) - ref.astype(jnp.float32)) ** 2)
    return compr, loss * weight


if __name__ == "__main__":
    key = jax.random.PRNGKey(0)
    k_an, k_pad, k_pred, k_ref = jax.random.split(key, 4)

    # Small synthetic "geometry": 32 molecules, up to 48 atoms each.
    B, N = 32, 48
    elements = jnp.array([1, 6, 7, 8], dtype=jnp.int32)            # H, C, N, O
    an = elements[jax.random.randint(k_an, (B, N), 0, 4)]
    n_atoms = jax.random.randint(k_pad, (B,), 10, N + 1)
    pad_mask = jnp.arange(N)[None, :] < n_atoms[:, None]
    an = jnp.where(pad_mask, an, 0).astype(jnp.int32)              # 0 = padding

    # init_dict = {1: 3.0, 6: 2.7, 7: 2.2, 8: 2.3}  (OptVcr.__init__)
    uan = elements
    compr0 = jnp.array([3.0, 2.7, 2.2, 2.3], dtype=jnp.float32)

    # Synthetic per-atom target property (e.g. 'charge') and its reference.
    pred = jax.random.normal(k_pred, (B, N), dtype=jnp.float32) * pad_mask
    ref = jax.random.normal(k_ref, (B, N), dtype=jnp.float32) * pad_mask
    charge_weight = 1.0
    tolerance = 1e-6
    prev_loss = jnp.float32(0.0)

    # Run 1: no clamp triggers; small tile_rows so the grid has >1 tile.
    compr_a, loss_a, conv_a = optvcr_step(
        an, uan, compr0, pred, ref,
        comp_r_min=2.0, comp_r_max=9.0, target_weight=charge_weight,
        prev_loss=prev_loss, tolerance=tolerance, tile_rows=8)
    # Run 2: comp_r_min=2.5 triggers the global min-clamp (2.2, 2.3 < 2.5);
    # default (auto) tile size.
    compr_b, loss_b, conv_b = optvcr_step(
        an, uan, compr0, pred, ref,
        comp_r_min=2.5, comp_r_max=9.0, target_weight=charge_weight,
        prev_loss=prev_loss, tolerance=tolerance)
    jax.block_until_ready((compr_a, loss_a, conv_a, compr_b, loss_b, conv_b))

    ref_compr_a, ref_loss_a = _torch_semantics_ref(
        an, uan, compr0, pred, ref, 2.0, 9.0, charge_weight)
    ref_compr_b, ref_loss_b = _torch_semantics_ref(
        an, uan, compr0, pred, ref, 2.5, 9.0, charge_weight)

    assert jnp.allclose(compr_a, ref_compr_a, atol=1e-6), "compr mismatch (a)"
    assert jnp.allclose(compr_b, ref_compr_b, atol=1e-6), "compr mismatch (b)"
    assert jnp.allclose(loss_a, ref_loss_a, rtol=1e-5, atol=1e-6), "loss mismatch (a)"
    assert jnp.allclose(loss_b, ref_loss_b, rtol=1e-5, atol=1e-6), "loss mismatch (b)"

    print("KERNEL_OK")
</pallas_src>

<mosaic_0001>
module attributes {stable_mosaic.version = 11 : i64} {
  func.func @_optvcr_fused_kernel(%arg0: i32, %arg1: memref<5xf32, #tpu.memory_space<smem>>, %arg2: memref<4xi32, #tpu.memory_space<smem>>, %arg3: memref<8x128xi32, #tpu.memory_space<vmem>>, %arg4: memref<8x128xf32, #tpu.memory_space<vmem>>, %arg5: memref<8x128xf32, #tpu.memory_space<vmem>>, %arg6: memref<8x128xf32, #tpu.memory_space<vmem>>, %arg7: memref<1x1x128xf32, #tpu.memory_space<vmem>>) attributes {dimension_semantics = [#tpu.dimension_semantics<parallel>], iteration_bounds = array<i64: 2>, scalar_prefetch = 0 : i64, scratch_operands = 0 : i64, tpu.core_type = #tpu.core_type<tc>, window_params = [{transform_indices = @transform_0, window_bounds = array<i64: 5>}, {transform_indices = @transform_1, window_bounds = array<i64: 4>}, {transform_indices = @transform_2, window_bounds = array<i64: 8, 128>}, {transform_indices = @transform_3, window_bounds = array<i64: 8, 128>}, {transform_indices = @transform_4, window_bounds = array<i64: 8, 128>}, {transform_indices = @transform_5, window_bounds = array<i64: 8, 128>}, {transform_indices = @transform_6, window_bounds = array<i64: 1, 1, 128>}]} {
    %c0 = arith.constant 0 : index
    %c0_0 = arith.constant 0 : index
    %0 = vector.load %arg3[%c0, %c0_0] : memref<8x128xi32, #tpu.memory_space<vmem>>, vector<8x128xi32>
    %c4 = arith.constant 4 : index
    %1 = memref.load %arg1[%c4] : memref<5xf32, #tpu.memory_space<smem>>
    %2 = vector.broadcast %1 : f32 to vector<8x128xf32>
    %c0_1 = arith.constant 0 : index
    %3 = memref.load %arg2[%c0_1] : memref<4xi32, #tpu.memory_space<smem>>
    %4 = vector.broadcast %3 : i32 to vector<8x128xi32>
    %5 = arith.cmpi eq, %0, %4 : vector<8x128xi32>
    %c0_2 = arith.constant 0 : index
    %6 = memref.load %arg1[%c0_2] : memref<5xf32, #tpu.memory_space<smem>>
    %7 = vector.broadcast %6 : f32 to vector<8x128xf32>
    %8 = arith.select %5, %7, %2 : vector<8x128xi1>, vector<8x128xf32>
    %c1 = arith.constant 1 : index
    %9 = memref.load %arg2[%c1] : memref<4xi32, #tpu.memory_space<smem>>
    %10 = vector.broadcast %9 : i32 to vector<8x128xi32>
    %11 = arith.cmpi eq, %0, %10 : vector<8x128xi32>
    %c1_3 = arith.constant 1 : index
    %12 = memref.load %arg1[%c1_3] : memref<5xf32, #tpu.memory_space<smem>>
    %13 = vector.broadcast %12 : f32 to vector<8x128xf32>
    %14 = arith.select %11, %13, %8 : vector<8x128xi1>, vector<8x128xf32>
    %c2 = arith.constant 2 : index
    %15 = memref.load %arg2[%c2] : memref<4xi32, #tpu.memory_space<smem>>
    %16 = vector.broadcast %15 : i32 to vector<8x128xi32>
    %17 = arith.cmpi eq, %0, %16 : vector<8x128xi32>
    %c2_4 = arith.constant 2 : index
    %18 = memref.load %arg1[%c2_4] : memref<5xf32, #tpu.memory_space<smem>>
    %19 = vector.broadcast %18 : f32 to vector<8x128xf32>
    %20 = arith.select %17, %19, %14 : vector<8x128xi1>, vector<8x128xf32>
    %c3 = arith.constant 3 : index
    %21 = memref.load %arg2[%c3] : memref<4xi32, #tpu.memory_space<smem>>
    %22 = vector.broadcast %21 : i32 to vector<8x128xi32>
    %23 = arith.cmpi eq, %0, %22 : vector<8x128xi32>
    %c3_5 = arith.constant 3 : index
    %24 = memref.load %arg1[%c3_5] : memref<5xf32, #tpu.memory_space<smem>>
    %25 = vector.broadcast %24 : f32 to vector<8x128xf32>
    %26 = arith.select %23, %25, %20 : vector<8x128xi1>, vector<8x128xf32>
    %c0_6 = arith.constant 0 : index
    %c0_7 = arith.constant 0 : index
    %27 = vector.load %arg6[%c0_6, %c0_7] : memref<8x128xf32, #tpu.memory_space<vmem>>, vector<8x128xf32>
    tpu.vector_store %arg6[%c0_6, %c0_7], %26 {strides = array<i32>} : memref<8x128xf32, #tpu.memory_space<vmem>>, vector<8x128xf32>,
    %c0_8 = arith.constant 0 : index
    %c0_9 = arith.constant 0 : index
    %28 = vector.load %arg4[%c0_8, %c0_9] : memref<8x128xf32, #tpu.memory_space<vmem>>, vector<8x128xf32>
    %c0_10 = arith.constant 0 : index
    %c0_11 = arith.constant 0 : index
    %29 = vector.load %arg5[%c0_10, %c0_11] : memref<8x128xf32, #tpu.memory_space<vmem>>, vector<8x128xf32>
    %30 = arith.subf %28, %29 : vector<8x128xf32>
    %31 = arith.mulf %30, %30 : vector<8x128xf32>
    %cst = arith.constant dense<0.000000e+00> : vector<128xf32>
    %32 = vector.multi_reduction <add>, %31, %cst [0] : vector<8x128xf32> to vector<128xf32>
    %33 = vector.shape_cast %32 : vector<128xf32> to vector<1x128xf32>
    %34 = vector.shape_cast %33 : vector<1x128xf32> to vector<1x1x128xf32>
    %c0_12 = arith.constant 0 : index
    %c0_13 = arith.constant 0 : index
    %c0_14 = arith.constant 0 : index
    %35 = vector.load %arg7[%c0_12, %c0_13, %c0_14] : memref<1x1x128xf32, #tpu.memory_space<vmem>>, vector<1x1x128xf32>
    tpu.vector_store %arg7[%c0_12, %c0_13, %c0_14], %34 {strides = array<i32>} : memref<1x1x128xf32, #tpu.memory_space<vmem>>, vector<1x1x128xf32>,
    return
  }
  func.func @transform_0(%arg0: i32) -> i32 {
    %c0_i32 = arith.constant 0 : i32
    %c0_i32_0 = arith.constant 0 : i32
    return %c0_i32 : i32
  }
  func.func @transform_1(%arg0: i32) -> i32 {
    %c0_i32 = arith.constant 0 : i32
    %c0_i32_0 = arith.constant 0 : i32
    return %c0_i32 : i32
  }
  func.func @transform_2(%arg0: i32) -> (i32, i32) {
    %c0_i32 = arith.constant 0 : i32
    %c0_i32_0 = arith.constant 0 : i32
    return %arg0, %c0_i32 : i32, i32
  }
  func.func @transform_3(%arg0: i32) -> (i32, i32) {
    %c0_i32 = arith.constant 0 : i32
    %c0_i32_0 = arith.constant 0 : i32
    return %arg0, %c0_i32 : i32, i32
  }
  func.func @transform_4(%arg0: i32) -> (i32, i32) {
    %c0_i32 = arith.constant 0 : i32
    %c0_i32_0 = arith.constant 0 : i32
    return %arg0, %c0_i32 : i32, i32
  }
  func.func @transform_5(%arg0: i32) -> (i32, i32) {
    %c0_i32 = arith.constant 0 : i32
    %c0_i32_0 = arith.constant 0 : i32
    return %arg0, %c0_i32 : i32, i32
  }
  func.func @transform_6(%arg0: i32) -> (i32, i32, i32) {
    %c0_i32 = arith.constant 0 : i32
    %c0_i32_0 = arith.constant 0 : i32
    %c0_i32_1 = arith.constant 0 : i32
    return %arg0, %c0_i32, %c0_i32_0 : i32, i32, i32
  }
}

</mosaic_0001>

<bundles_post_ra>
// kernel: tpu_custom_call.1
= control target key start
LH: loop header
LB: loop body
LE: loop exit
PB: predicated region body
PF: predicated region fallthrough
CT: control target
= control target key end

     0   :  { %s1237_s0 = inlined_call_operand.hbm [shape: f32[5], index: 0, kind: input, shape index: {}]   ;;  %s1238_s1 = inlined_call_operand.hbm [shape: s32[4], index: 1, kind: input, shape index: {}]   ;;  %s1239_s2 = inlined_call_operand.hbm [shape: s32[16,128], index: 2, kind: input, shape index: {}]   ;;  %s1240_s3 = inlined_call_operand.hbm [shape: f32[16,128], index: 3, kind: input, shape index: {}]   ;;  %s1241_s4 = inlined_call_operand.hbm [shape: f32[16,128], index: 4, kind: input, shape index: {}]   ;;  %s1242_s5 = inlined_call_operand.hbm [shape: f32[16,128], index: 5, kind: output, shape index: {0}]   ;;  %s1243_s6 = inlined_call_operand.hbm [shape: f32[2,1,128], index: 6, kind: output, shape index: {1}]  }
   0x1   :  { %1248 = sst [smem:[#allocation24_spill]] %s1237_s0 }
   0x2   :  { %1249 = sst [smem:[#allocation25_spill]] %s1238_s1 }
   0x3   :  { %1250 = sst [smem:[#allocation26_spill]] %s1240_s3 }
   0x4   :  { %12 = vsyncpa [#allocation5], 0 }
   0x5   :  { %13 = vsyncpa [#allocation7], 0 }
   0x6   :  { %14 = vsyncpa [#allocation3], 0 }
   0x7   :  { %16 = vsyncpa [#allocation3 + $0x1], 0 }
   0x8   :  { %17 = vsyncpa [#allocation10], 0 }
   0x9   :  { %19 = vsyncpa [#allocation10 + $0x1], 0 }
   0xa   :  { %20 = vsyncpa [#allocation4], 0 }
   0xb   :  { %22 = vsyncpa [#allocation4 + $0x1], 0 }
   0xc   :  { %23 = vsyncpa [#allocation14], 0 }
   0xd   :  { %25 = vsyncpa [#allocation14 + $0x1], 0  ;;  %s996_s21 = smov 0   ;;  %s998_s22 = smov 0  }
   0xe   :  { %s1000_s23 = smov 0   ;;  %s1002_s24 = smov 0  }
   0xf LB: > { %1251 = sst [smem:[#allocation21_spill]] %s957_s24  ;;  %s1017_s25 = sadd.s32 1, %s957_s24   ;;  %s957_s24 = sphi %s1002_s24, %s1265_s24   ;;  %s953_s23 = sphi %s1000_s23, %s1269_s23   ;;  %s949_s22 = sphi %s998_s22, %s1268_s22   ;;  %s945_s21 = sphi %s996_s21, %s1267_s21  }
  0x10   : > { %1252 = sst [smem:[#allocation22_spill]] %s1017_s25  ;;  %s80_s26 = sadd.s32 1, %s953_s23 }
  0x11   : > { %s77_s27 = ssub.s32 %s957_s24, %s1017_s25  ;;  %p87_p0 = scmp.ne.s32.totalorder %s953_s23, %s949_s22 }
  0x12   : > { %p78_p1 = scmp.eq.s32.totalorder %s77_s27, 0  ;;  %p88_p2 = scmp.eq.s32.totalorder %s957_s24, 0 }
  0x13   : > { %p689_p4 = scmp.lt.s32.totalorder %s957_s24, 2  ;;  %s1244_s29 = sand.u32 1, %s953_s23  }
  0x14   : > { %s1028_s28 = scalar_select %p78_p1, %s953_s23, %s80_s26  }
  0x15   : > { %p89_p5 = por %p88_p2, %p87_p0  ;;  %s1036_s30 = sshll.u32 %s1244_s29, 3 }
  0x16   : > { %1253 = sst [smem:[#allocation23_spill]] %s1028_s28  ;;  %s1039_s7 = sshll.u32 %s957_s24, 3 }
  0x17   : > { %p1041_p6 = pnand %p689_p4, %p89_p5  ;;  %s260_s9 = sand.u32 1, %s957_s24  }
  0x18   : > { %s1255_s3 = sld [smem:[#allocation26_spill]]  ;;  %s264_s14 = scalar_lea.vmem [#allocation9], %s1036_s30 }
  0x19   : > { %s272_s15 = sshll.u32 %s264_s14, 4  ;;  %s1051_s16 = scalar_lea.sflag [#allocation10], %s260_s9  ;;  %s273_s15 = int_to_ptr.vmem [resolvable:$true] %s272_s15 }
  0x1a   : > { %p731_p8 = pneg %p1041_p6 }
  0x1e   : > { %s268_s12 = scalar_lea.hbm %s1255_s3, %s1039_s7  ;;  %s734_s26 = scalar_lea.hbm %s1255_s3, 16 }
  0x1f   : > { %s270_s13 = sshll.u32 %s268_s12, 4  ;;  %s271_s13 = int_to_ptr.hbm [resolvable:$true] %s270_s13 }
  0x20   : > { %s727_s17 = sshra.s32 %s271_s13, 4  ;;  %s728_s17 = int_to_ptr.hbm [resolvable:$true] %s727_s17 }
  0x21   : > { %s729_s18 = scalar_lea.hbm %s728_s17, 8  ;;  %p735_p11 = scmp.lt.s32.totalorder %s728_s17, %s1255_s3 }
  0x22   : > { %p730_p7 = scmp.ne.s32.totalorder %s728_s17, %s729_s18  ;;  %p736_p12 = scmp.lt.s32.totalorder %s734_s26, %s729_s18 }
  0x24   : > { %p732_p9 = pnand %p731_p8, %p730_p7  ;;  %p737_p13 = por %p736_p12, %p735_p11 }
  0x26   : > { %p733_p10 = pneg %p732_p9 }
  0x28   : > { %p738_p1 = pnand %p737_p13, %p733_p10 }
  0x2a   : > { %741 = shalt.err (!%p738_p1)
}
  0x2b   : > { %676 = dma.hbm_to_vmem [thread:$0]  (!%p1041_p6), %s271_s13, 128, %s273_s15, %s1051_s16  }
  0x2c   : > { %s1068_s9 = sadd.s32 4294967295, %s957_s24   ;;  %s616_s11 = sadd.s32 4294967294, %s957_s24  }
  0x2d   : > { %p93_p2 = scmp.ne.s32.totalorder %s949_s22, %s945_s21  ;;  %p94_p4 = scmp.eq.s32.totalorder %s1068_s9, 0 }
  0x2e   : > { %p169_p5 = scmp.eq.s32.totalorder %s1068_s9, 1  ;;  %p175_p7 = scmp.eq.s32.totalorder %s616_s11, 1 }
  0x2f   : > { %p1077_p9 = por %p94_p4, %p93_p2  ;;  %p617_p10 = scmp.ge.s32.totalorder %s957_s24, 1 }
  0x30   : > { %p1085_p11 = por %p169_p5, %p87_p0  ;;  %p1089_p12 = por %p175_p7, %p93_p2 }
  0x31   : > { %p208_p13 = scmp.lt.s32.totalorder %s957_s24, 3  ;;  %s1259_s0 = sld [smem:[#allocation24_spill]] }
  0x32   : > { %s1261_s1 = sld [smem:[#allocation25_spill]]  ;;  %s249_s15 = scalar_lea.hbm %s1239_s2, %s1039_s7 }
  0x33   : > { %p1097_p1 = pnand %p617_p10, %p208_p13  ;;  %s251_s17 = sshll.u32 %s249_s15, 4  ;;  %s252_s17 = int_to_ptr.hbm [resolvable:$true] %s251_s17 }
  0x34   : > { %s245_s29 = scalar_lea.vmem [#allocation8], %s1036_s30  ;;  %s959_s3 = smov [#allocation2]  }
  0x35   : > { %p663_p0 = pneg %p1097_p1  ;;  %s960_s28 = smov [#allocation6]  }
  0x36   : > { %s1262_s20 = sand.u32 1, %s953_s23  }
  0x37   : > { %s220_s18 = sshll.u32 %s1259_s0, 4  ;;  %p664_p2 = pnand %p663_p0, %p94_p4  ;;  %s221_s18 = int_to_ptr.hbm [resolvable:$true] %s220_s18 }
  0x38   : > { %s230_s27 = sshll.u32 %s1261_s1, 4  ;;  %s253_s0 = sshll.u32 %s245_s29, 4  ;;  %s231_s27 = int_to_ptr.hbm [resolvable:$true] %s230_s27  ;;  %s254_s0 = int_to_ptr.vmem [resolvable:$true] %s253_s0 }
  0x39   : > { %666 = dma.hbm_to_smem (!%p664_p2), %s221_s18, 16, %s959_s3, [#allocation5]  }
  0x3a   : > { %669 = dma.hbm_to_smem (!%p664_p2), %s231_s27, 16, %s960_s28, [#allocation7]  }
  0x3b   : > { %s242_s26 = scalar_lea.sflag [#allocation3], %s1262_s20  ;;  %s787_s1 = sshra.s32 %s252_s17, 4  ;;  %s788_s1 = int_to_ptr.hbm [resolvable:$true] %s787_s1 }
  0x3c   : > { %s789_s25 = scalar_lea.hbm %s788_s1, 8  ;;  %s794_s29 = scalar_lea.hbm %s1239_s2, 16 }
  0x3d   : > { %p790_p5 = scmp.ne.s32.totalorder %s788_s1, %s789_s25  ;;  %p795_p13 = scmp.lt.s32.totalorder %s788_s1, %s1239_s2 }
  0x3e   : > { %p796_p0 = scmp.lt.s32.totalorder %s794_s29, %s789_s25 }
  0x3f   : > { %p792_p7 = pnand %p790_p5, %p731_p8 }
  0x40   : > { %p797_p2 = por %p796_p0, %p795_p13 }
  0x41   : > { %p793_p10 = pneg %p792_p7 }
  0x43   : > { %p798_p3 = pnand %p797_p2, %p793_p10 }
  0x45   : > { %801 = shalt.err (!%p798_p3)
}
  0x46   : > { %673 = dma.hbm_to_vmem [thread:$0]  (!%p1041_p6), %s252_s17, 128, %s254_s0, %s242_s26  }
  0x47   : > { %s287_s18 = scalar_lea.hbm %s1241_s4, %s1039_s7  ;;  %s283_s27 = scalar_lea.vmem [#allocation11], %s1036_s30 }
  0x48   : > { %s291_s20 = sshll.u32 %s283_s27, 4  ;;  %s289_s10 = sshll.u32 %s287_s18, 4  ;;  %s292_s20 = int_to_ptr.vmem [resolvable:$true] %s291_s20  ;;  %s290_s10 = int_to_ptr.hbm [resolvable:$true] %s289_s10 }
  0x49   : > { %s817_s1 = sshra.s32 %s290_s10, 4  ;;  %s824_s0 = scalar_lea.hbm %s1241_s4, 16  ;;  %s818_s1 = int_to_ptr.hbm [resolvable:$true] %s817_s1 }
  0x4a   : > { %s819_s24 = scalar_lea.hbm %s818_s1, 8  ;;  %p825_p10 = scmp.lt.s32.totalorder %s818_s1, %s1241_s4 }
  0x4b   : > { %p820_p5 = scmp.ne.s32.totalorder %s818_s1, %s819_s24  ;;  %p826_p13 = scmp.lt.s32.totalorder %s824_s0, %s819_s24 }
  0x4d   : > { %p822_p3 = pnand %p820_p5, %p731_p8  ;;  %p827_p0 = por %p826_p13, %p825_p10 }
  0x4f   : > { %p823_p7 = pneg %p822_p3 }
  0x51   : > { %p828_p2 = pnand %p827_p0, %p823_p7 }
  0x53   : > { %831 = shalt.err (!%p828_p2)
}
  0x54   : > { %679 = dma.hbm_to_vmem [thread:$0]  (!%p1041_p6), %s290_s10, 128, %s292_s20, %s1051_s16  }
  0x55   : > { %300 = sbr.rel (%p1097_p1) target bundleno = 135 (0x87), region = 40 }
  0x5a   : > { %920 = dma.done.wait (%p94_p4), [#allocation5], 16  }
  0x5b   : > { %922 = vsyncadd (%p94_p4), [#allocation5], 4294967280 }
  0x5c   : > { %924 = dma.done.wait (%p94_p4), [#allocation7], 16  }
  0x5d   : > { %926 = vsyncadd (%p94_p4), [#allocation7], 4294967280  ;;  %s1154_s30 = sand.u32 1, %s949_s22  }
  0x5e   : > { %s1157_s7 = sshll.u32 %s1154_s30, 3  ;;  %s313_s8 = scalar_lea.sflag [#allocation3], %s1154_s30 }
  0x5f   : > { %s316_s16 = scalar_lea.vmem [#allocation8], %s1157_s7 }
  0x60   : > { %928 = dma.done.wait (%p1077_p9), %s313_s8, 128  }
  0x61   : > { %930 = vsyncadd (%p1077_p9), %s313_s8, 4294967168  ;;  %s322_s19 = sand.u32 1, %s1068_s9   ;;  %s326_s15 = scalar_lea.vmem [#allocation9], %s1157_s7 }
  0x62   : > { %s323_s29 = scalar_lea.sflag [#allocation10], %s322_s19 }
  0x63   : > { %932 = dma.done.wait (%p1077_p9), %s323_s29, 256  }
  0x64   : > { %934 = vsyncadd (%p1077_p9), %s323_s29, 4294967040  ;;  %s336_s3 = scalar_lea.vmem [#allocation11], %s1157_s7 }
  0x65   : > { %342 = sfence }
  0x66   : > { %s634_s28 = sld [smem:[#allocation2 + $0x4]]  ;;  %v409_v0 = vld [vmem:[%s326_s15] sm:$0xff]  ;;  %v410_v1 = vld [vmem:[%s336_s3] sm:$0xff]  ;;  %s642_s25 = sshll.u32 %s1068_s9, 3 }
  0x67   : > { %s384_s18 = sld [smem:[#allocation6]]  ;;  %v411_v2 = vsub.f32 %v409_v0, %v410_v1  ;;  %v381_v4 = vld [vmem:[%s316_s16] sm:$0xff]  ;;  %s435_s26 = scalar_lea.hbm %s1242_s5, %s642_s25 }
  0x68   : > { %s387_s27 = sld [smem:[#allocation2]]  ;;  %s374_s8 = scalar_lea.vmem [#allocation12], %s1157_s7 }
  0x69   : > { %s635_s20 = sld [smem:[#allocation6 + $0x1]]  ;;  %v412_v3 = vmul.f32 %v411_v2, %v411_v2  ;;  %s1177_s16 = sshll.u32 %s374_s8, 4  ;;  %s438_s16 = int_to_ptr.vmem [resolvable:$true] %s1177_s16 }
  0x6a   : > { %s636_s10 = sld [smem:[#allocation2 + $0x1]]  ;;  %s380_s19 = scalar_lea.vmem [#allocation13], %s1154_s30 }
  0x6b   : > { %s637_s1 = sld [smem:[#allocation6 + $0x2]]  ;;  %v413_v5 = vrot.slane %v412_v3, 4  ;;  %s1180_s29 = sshll.u32 %s380_s19, 4  ;;  %s451_s29 = int_to_ptr.vmem [resolvable:$true] %s1180_s29 }
  0x6c   : > { %v383_v6 = vstv %s634_s28  ;;  %s638_s12 = sld [smem:[#allocation2 + $0x2]]  ;;  %s448_s28 = scalar_lea.hbm %s1243_s6, %s1068_s9 }
  0x6d   : > { %v385_v7 = vstv %s384_s18  ;;  %s639_s24 = sld [smem:[#allocation6 + $0x3]]  ;;  %v414_v8 = vadd.f32 %v413_v5, %v412_v3  ;;  %s439_s18 = sshll.u32 %s435_s26, 4  ;;  %s440_s18 = int_to_ptr.hbm [resolvable:$true] %s439_s18 }
  0x6e   : > { %vm386_vm0 = vcmp.eq.s32.totalorder %v381_v4, %v385_v7  ;;  %v388_v9 = vstv %s387_s27  ;;  %s640_s11 = sld [smem:[#allocation2 + $0x3]]  ;;  %s1186_s7 = sshll.u32 %s448_s28, 4  ;;  %s453_s7 = int_to_ptr.hbm [resolvable:$true] %s1186_s7 }
  0x6f   : > { %v389_v10 = vsel %vm386_vm0, %v388_v9, %v383_v6  ;;  %v391_v11 = vstv %s635_s20  ;;  %v415_v12 = vrot.slane %v414_v8, 2  ;;  %s421_s9 = scalar_lea.sflag [#allocation4], %s1154_s30  ;;  %s861_s27 = sshra.s32 %s440_s18, 4  ;;  %s862_s27 = int_to_ptr.hbm [resolvable:$true] %s861_s27 }
  0x70   : > { %vm392_vm1 = vcmp.eq.s32.totalorder %v381_v4, %v391_v11  ;;  %v394_v13 = vstv %s636_s10  ;;  %s863_s20 = scalar_lea.hbm %s862_s27, 8  ;;  %p868_p9 = scmp.lt.s32.totalorder %s862_s27, %s1242_s5 }
  0x71   : > { %v395_v14 = vsel %vm392_vm1, %v394_v13, %v389_v10  ;;  %v397_v15 = vstv %s637_s1  ;;  %v416_v16 = vadd.f32 %v415_v12, %v414_v8  ;;  %p864_p6 = scmp.ne.s32.totalorder %s862_s27, %s863_s20 }
  0x72   : > { %vm398_vm2 = vcmp.eq.s32.totalorder %v381_v4, %v397_v15  ;;  %v400_v17 = vstv %s638_s12  ;;  %s867_s12 = scalar_lea.hbm %s1242_s5, 16 }
  0x73   : > { %v401_v18 = vsel %vm398_vm2, %v400_v17, %v395_v14  ;;  %v403_v19 = vstv %s639_s24  ;;  %v417_v20 = vrot.slane %v416_v16, 1  ;;  %p865_p8 = pnand %p864_p6, %p1085_p11  ;;  %p869_p1 = scmp.lt.s32.totalorder %s867_s12, %s863_s20 }
  0x74   : > { %vm404_vm3 = vcmp.eq.s32.totalorder %v381_v4, %v403_v19  ;;  %v406_v21 = vstv %s640_s11 }
  0x75   : > { %v407_v22 = vsel %vm404_vm3, %v406_v21, %v401_v18  ;;  %v418_v23 = vadd.f32 %v417_v20, %v416_v16  ;;  %p866_p4 = pneg %p865_p8  ;;  %p870_p5 = por %p869_p1, %p868_p9 }
  0x76   : > { %408 = vst [vmem:[%s374_s8] sm:$0xff] %v407_v22 }
  0x77   : > { %419 = vst [vmem:[%s380_s19] sm:$0x1] %v418_v23  ;;  %p871_p3 = pnand %p870_p5, %p866_p4 }
  0x79   : > { %874 = shalt.err (!%p871_p3)
}
  0x7a   : > { %659 = dma.vmem_to_hbm [thread:$0]  (%p1085_p11), %s438_s16, 128, %s440_s18, %s421_s9  }
  0x7b   : > { %s426_s11 = scalar_lea.sflag [#allocation14], %s1154_s30  ;;  %s889_s0 = sshra.s32 %s453_s7, 4  ;;  %s890_s0 = int_to_ptr.hbm [resolvable:$true] %s889_s0 }
  0x7c   : > { %s891_s17 = scalar_lea.hbm %s890_s0, 1  ;;  %s895_s19 = scalar_lea.hbm %s1243_s6, 2 }
  0x7d   : > { %p892_p7 = scmp.ne.s32.totalorder %s890_s0, %s891_s17  ;;  %p896_p0 = scmp.lt.s32.totalorder %s890_s0, %s1243_s6 }
  0x7e   : > { %p897_p2 = scmp.lt.s32.totalorder %s895_s19, %s891_s17 }
  0x7f   : > { %p893_p10 = pnand %p892_p7, %p1085_p11 }
  0x80   : > { %p898_p6 = por %p897_p2, %p896_p0 }
  0x81   : > { %p894_p13 = pneg %p893_p10 }
  0x83   : > { %p899_p8 = pnand %p898_p6, %p894_p13 }
  0x85   : > { %902 = shalt.err (!%p899_p8)
}
  0x86   : > { %660 = dma.vmem_to_hbm [thread:$0]  (%p1085_p11), %s451_s29, 16, %s453_s7, %s426_s11  }
  0x87 PF: > { %s1263_s30 = sld [smem:[#allocation21_spill]]  ;;  %s464_s16 = sand.u32 1, %s945_s21  }
  0x88   : > { %s465_s28 = scalar_lea.sflag [#allocation4], %s464_s16 }
  0x8d   : > { %p1264_p4 = scmp.ge.s32.totalorder %s1263_s30, 2 }
  0x8f   : > { %p681_p9 = pnand %p1264_p4, %p1089_p12 }
  0x91   : > { %p682_p1 = pneg %p681_p9 }
  0x93   : > { %936 = dma.done.wait (%p682_p1), %s465_s28, 128  }
  0x94   : > { %938 = vsyncadd (%p682_p1), %s465_s28, 4294967168  ;;  %s475_s18 = scalar_lea.sflag [#allocation14], %s464_s16 }
  0x95   : > { %940 = dma.done.wait (%p682_p1), %s475_s18, 16  }
  0x96   : > { %942 = vsyncadd (%p682_p1), %s475_s18, 4294967280  ;;  %s1265_s24 = sld [smem:[#allocation22_spill]]  ;;  %s1267_s21 = smov %s949_s22 }
  0x97   : > { %s1266_s13 = sld [smem:[#allocation23_spill]]  ;;  %s1268_s22 = smov %s953_s23 }
  0x9c   : > { %p28_p11 = scmp.ge.s32.totalorder %s1265_s24, 4  }
  0x9d   : > { %s1269_s23 = smov %s1266_s13 }
  0x9e   :  { %30 = sbr.rel (!%p28_p11) target bundleno = 15 (0xf), region = 135 }
  0xa3   :  { %480 = vsyncpa [#allocation3], 1 }
  0xa4   :  { %482 = vsyncpa [#allocation3 + $0x1], 1 }
  0xa5   :  { %483 = vsyncpa [#allocation10], 1 }
  0xa6   :  { %485 = vsyncpa [#allocation10 + $0x1], 1 }
  0xa7   :  { %486 = vsyncpa [#allocation4], 1 }
  0xa8   :  { %488 = vsyncpa [#allocation4 + $0x1], 1 }
  0xa9   :  { %489 = vsyncpa [#allocation14], 1 }
  0xaa   :  { %491 = vsyncpa [#allocation14 + $0x1], 1 }
  0xab   :  { %492 = vsyncpa [#allocation5], 1 }
  0xac   :  { %494 = vsyncpa [#allocation5 + $0x1], 1 }
  0xad   :  { %495 = vsyncpa [#allocation7], 1 }

</bundles_post_ra>
